<compile_context>
chip_gen: v7x
topology: tpu7x:2x2x1
jax: 0.10.0
libtpu: 0.0.40
codegen_flags: <defaults>
</compile_context>

<pallas_src>
import functools
from typing import List

import jax
import jax.numpy as jnp
from jax.experimental import pallas as pl
from jax.experimental.pallas import tpu as pltpu


def _round_up(n: int, m: int) -> int:
    return ((n + m - 1) // m) * m


def _mlp_fused_kernel(*refs, n_layers: int):
    """Fused MLP: refs = (x, w0, b0, w1, b1, ..., w_{L-1}, b_{L-1}, out).

    x and the weights are bfloat16; biases and the output are float32.
    The layer loop is unrolled; intermediates stay in VMEM/vregs (no HBM
    round trips between layers).
    """
    x_ref = refs[0]
    o_ref = refs[-1]

    h_bf16 = x_ref[...]                      # (TB, In_pad) bf16
    for i in range(n_layers):
        w_ref = refs[1 + 2 * i]              # (In_pad_i, Out_pad_i) bf16
        b_ref = refs[2 + 2 * i]              # (1, Out_pad_i) f32
        # Bias folded into the f32 accumulator; matmul runs on the MXU in
        # bf16 with f32 accumulation.
        acc = b_ref[...] + jnp.dot(h_bf16, w_ref[...],
                                   preferred_element_type=jnp.float32)
        if i < n_layers - 1:
            acc = jnp.maximum(acc, 0.0)      # ReLU in f32 (VPU)
            h_bf16 = acc.astype(jnp.bfloat16)
        else:
            o_ref[...] = acc.astype(o_ref.dtype)


def mlp_forward_fused(x, w_pads, b_pads, *, output_size: int):
    """x: (B, In) f32; w_pads[i]: (In_pad_i, Out_pad_i) bf16;
    b_pads[i]: (1, Out_pad_i) f32.  Returns (B, output_size) f32."""
    n_layers = len(w_pads)
    B, In = x.shape
    In_pad = w_pads[0].shape[0]
    Out_pad = w_pads[-1].shape[1]

    # bf16 LHS packs 2 rows/sublane -> pad batch to a multiple of 16.
    B_pad = _round_up(max(B, 16), 16)

    # Batch tile: biggest power-of-two tile (>=16) dividing B_pad, capped at
    # 256 so multiple grid steps exist for megacore sharding on large batches.
    TB = 16
    for cand in (256, 128, 64, 32, 16):
        if B_pad % cand == 0:
            TB = cand
            break
    nb = B_pad // TB

    # Zero-pad the input to a lane-dense, sublane-packed block; cast to bf16.
    x_pad = jnp.zeros((B_pad, In_pad), jnp.bfloat16)
    x_pad = x_pad.at[:B, :In].set(x.astype(jnp.bfloat16))

    # Interleave weights and biases as kernel inputs.  Weights/biases use a
    # constant index_map -> DMA'd once, resident across batch tiles.
    flat_inputs = [x_pad]
    in_specs = [pl.BlockSpec((TB, In_pad), lambda i: (i, 0))]
    for w_p, b_p in zip(w_pads, b_pads):
        flat_inputs.append(w_p)
        in_specs.append(pl.BlockSpec(w_p.shape, lambda i: (0, 0)))
        flat_inputs.append(b_p)
        in_specs.append(pl.BlockSpec(b_p.shape, lambda i: (0, 0)))
    out_spec = pl.BlockSpec((TB, Out_pad), lambda i: (i, 0))

    # --- VMEM budget + cost estimate ---------------------------------------
    weight_bytes = 0
    flops = 0
    for w_p, b_p in zip(w_pads, b_pads):
        ki, ni = int(w_p.shape[0]), int(w_p.shape[1])
        weight_bytes += ki * ni * 2 + ni * 4          # bf16 W + f32 b
        flops += 2 * B_pad * ki * ni
    io_block_bytes = TB * In_pad * 2 + TB * Out_pad * 4
    # 2x for double buffering + 1 MiB headroom, clamped to [4, 48] MiB so it
    # never exceeds v7x's 64 MiB physical VMEM.
    vmem_needed = 2 * (io_block_bytes + weight_bytes) + (1 << 20)
    vmem_limit = int(min(max(vmem_needed, 4 << 20), 48 << 20))

    bytes_accessed = (B_pad * In_pad * 2          # x (bf16)
                      + weight_bytes              # all W/b
                      + B_pad * Out_pad * 4)      # output (f32)
    cost = pl.CostEstimate(flops=flops, transcendentals=0,
                           bytes_accessed=bytes_accessed)

    kernel = functools.partial(_mlp_fused_kernel, n_layers=n_layers)
    y_pad = pl.pallas_call(
        kernel,
        out_shape=jax.ShapeDtypeStruct((B_pad, Out_pad), jnp.float32),
        grid=(nb,),
        in_specs=in_specs,
        out_specs=out_spec,
        compiler_params=pltpu.CompilerParams(
            dimension_semantics=("parallel",),
            vmem_limit_bytes=vmem_limit),
        cost_estimate=cost,
    )(*flat_inputs)

    return y_pad[:B, :output_size]


class MLP:
    """JAX/Pallas port of the PyTorch MLP module (ReLU between layers)."""

    def __init__(self, input_size: int, output_size: int,
                 hidden_sizes: List[int] = [], key=None):
        if key is None:
            key = jax.random.PRNGKey(0)
        self.output_size = output_size
        self.params = []        # f32 masters: (W_transposed (in, out), b (out,))
        self._w_pads = []       # bf16 padded weights (In_pad, Out_pad)
        self._b_pads = []       # f32 padded biases (1, Out_pad)

        # TODO(synk): use 256-granular feature padding on v6e/v7x for large
        # layers (2x256x256 MXU); 128 is fine at these sizes and on v5e.
        pad_gran = 128

        prev_h = input_size
        for h in hidden_sizes + [output_size]:
            key, kw, kb = jax.random.split(key, 3)
            # Mimic torch.nn.Linear default init: U(-1/sqrt(fan_in), 1/sqrt(fan_in)).
            bound = 1.0 / (prev_h ** 0.5)
            w = jax.random.uniform(kw, (h, prev_h), jnp.float32, -bound, bound)
            b = jax.random.uniform(kb, (h,), jnp.float32, -bound, bound)
            w_t = w.T                                   # (in, out)
            self.params.append((w_t, b))

            in_pad = _round_up(prev_h, pad_gran)
            out_pad = _round_up(h, pad_gran)
            w_pad = jnp.zeros((in_pad, out_pad), jnp.bfloat16)
            w_pad = w_pad.at[:prev_h, :h].set(w_t.astype(jnp.bfloat16))
            b_pad = jnp.zeros((1, out_pad), jnp.float32)
            b_pad = b_pad.at[0, :h].set(b)
            self._w_pads.append(w_pad)
            self._b_pads.append(b_pad)
            prev_h = h

        # Jit the whole forward (pad + pallas_call + slice): removes per-call
        # dispatch overhead and fuses the pad/slice around the kernel.
        self._forward = jax.jit(
            functools.partial(mlp_forward_fused, output_size=output_size))

    def __call__(self, x):
        return self._forward(x, tuple(self._w_pads), tuple(self._b_pads))


if __name__ == "__main__":
    key = jax.random.PRNGKey(0)
    key, kx, kp = jax.random.split(key, 3)

    batch = 8
    input_size = 32
    hidden_sizes = [64, 48]
    output_size = 16

    x = jax.random.normal(kx, (batch, input_size), jnp.float32)

    mlp = MLP(input_size, output_size, hidden_sizes, key=kp)
    out = mlp(x)
    out = jax.block_until_ready(out)

    # Pure-JAX f32 reference of the same semantics.  The kernel does bf16
    # matmuls with f32 accumulation, so allow ~1e-2-level relative error.
    ref = x
    for i, (w_t, b) in enumerate(mlp.params):
        ref = ref @ w_t + b
        if i < len(mlp.params) - 1:
            ref = jnp.maximum(ref, 0.0)

    assert out.shape == (batch, output_size)
    assert jnp.allclose(out, ref, atol=5e-2, rtol=5e-2), (
        float(jnp.max(jnp.abs(out - ref))))

    print("KERNEL_OK")
</pallas_src>

<mosaic_0001>
module attributes {stable_mosaic.version = 11 : i64} {
  func.func @_mlp_fused_kernel(%arg0: i32, %arg1: memref<16x128xbf16, #tpu.memory_space<vmem>>, %arg2: memref<128x128xbf16, #tpu.memory_space<vmem>>, %arg3: memref<1x128xf32, #tpu.memory_space<vmem>>, %arg4: memref<128x128xbf16, #tpu.memory_space<vmem>>, %arg5: memref<1x128xf32, #tpu.memory_space<vmem>>, %arg6: memref<128x128xbf16, #tpu.memory_space<vmem>>, %arg7: memref<1x128xf32, #tpu.memory_space<vmem>>, %arg8: memref<16x128xf32, #tpu.memory_space<vmem>>) attributes {dimension_semantics = [#tpu.dimension_semantics<parallel>], iteration_bounds = array<i64: 1>, scalar_prefetch = 0 : i64, scratch_operands = 0 : i64, tpu.core_type = #tpu.core_type<tc>, window_params = [{transform_indices = @transform_0, window_bounds = array<i64: 16, 128>}, {pipeline_mode = #tpu.pipeline_mode<synchronous>, transform_indices = @transform_1, window_bounds = array<i64: 128, 128>}, {pipeline_mode = #tpu.pipeline_mode<synchronous>, transform_indices = @transform_2, window_bounds = array<i64: 1, 128>}, {pipeline_mode = #tpu.pipeline_mode<synchronous>, transform_indices = @transform_3, window_bounds = array<i64: 128, 128>}, {pipeline_mode = #tpu.pipeline_mode<synchronous>, transform_indices = @transform_4, window_bounds = array<i64: 1, 128>}, {pipeline_mode = #tpu.pipeline_mode<synchronous>, transform_indices = @transform_5, window_bounds = array<i64: 128, 128>}, {pipeline_mode = #tpu.pipeline_mode<synchronous>, transform_indices = @transform_6, window_bounds = array<i64: 1, 128>}, {transform_indices = @transform_7, window_bounds = array<i64: 16, 128>}]} {
    %c0 = arith.constant 0 : index
    %c0_0 = arith.constant 0 : index
    %0 = vector.load %arg1[%c0, %c0_0] : memref<16x128xbf16, #tpu.memory_space<vmem>>, vector<16x128xbf16>
    %c0_1 = arith.constant 0 : index
    %c0_2 = arith.constant 0 : index
    %1 = vector.load %arg3[%c0_1, %c0_2] : memref<1x128xf32, #tpu.memory_space<vmem>>, vector<1x128xf32>
    %c0_3 = arith.constant 0 : index
    %c0_4 = arith.constant 0 : index
    %2 = vector.load %arg2[%c0_3, %c0_4] : memref<128x128xbf16, #tpu.memory_space<vmem>>, vector<128x128xbf16>
    %cst = arith.constant dense<0.000000e+00> : vector<16x128xf32>
    %3 = tpu.matmul %0, %2, %cst {dimension_numbers = #tpu.dot_dimension_numbers<[1], [0], [0], [1], [0, 0, 1, 1], [], []>} : vector<16x128xbf16>, vector<128x128xbf16>, vector<16x128xf32> -> vector<16x128xf32>
    %4 = vector.broadcast %1 : vector<1x128xf32> to vector<16x128xf32>
    %5 = arith.addf %4, %3 : vector<16x128xf32>
    %cst_5 = arith.constant 0.000000e+00 : f32
    %6 = vector.broadcast %cst_5 : f32 to vector<16x128xf32>
    %7 = arith.maximumf %5, %6 : vector<16x128xf32>
    %8 = arith.truncf %7 : vector<16x128xf32> to vector<16x128xbf16>
    %c0_6 = arith.constant 0 : index
    %c0_7 = arith.constant 0 : index
    %9 = vector.load %arg5[%c0_6, %c0_7] : memref<1x128xf32, #tpu.memory_space<vmem>>, vector<1x128xf32>
    %c0_8 = arith.constant 0 : index
    %c0_9 = arith.constant 0 : index
    %10 = vector.load %arg4[%c0_8, %c0_9] : memref<128x128xbf16, #tpu.memory_space<vmem>>, vector<128x128xbf16>
    %cst_10 = arith.constant dense<0.000000e+00> : vector<16x128xf32>
    %11 = tpu.matmul %8, %10, %cst_10 {dimension_numbers = #tpu.dot_dimension_numbers<[1], [0], [0], [1], [0, 0, 1, 1], [], []>} : vector<16x128xbf16>, vector<128x128xbf16>, vector<16x128xf32> -> vector<16x128xf32>
    %12 = vector.broadcast %9 : vector<1x128xf32> to vector<16x128xf32>
    %13 = arith.addf %12, %11 : vector<16x128xf32>
    %cst_11 = arith.constant 0.000000e+00 : f32
    %14 = vector.broadcast %cst_11 : f32 to vector<16x128xf32>
    %15 = arith.maximumf %13, %14 : vector<16x128xf32>
    %16 = arith.truncf %15 : vector<16x128xf32> to vector<16x128xbf16>
    %c0_12 = arith.constant 0 : index
    %c0_13 = arith.constant 0 : index
    %17 = vector.load %arg7[%c0_12, %c0_13] : memref<1x128xf32, #tpu.memory_space<vmem>>, vector<1x128xf32>
    %c0_14 = arith.constant 0 : index
    %c0_15 = arith.constant 0 : index
    %18 = vector.load %arg6[%c0_14, %c0_15] : memref<128x128xbf16, #tpu.memory_space<vmem>>, vector<128x128xbf16>
    %cst_16 = arith.constant dense<0.000000e+00> : vector<16x128xf32>
    %19 = tpu.matmul %16, %18, %cst_16 {dimension_numbers = #tpu.dot_dimension_numbers<[1], [0], [0], [1], [0, 0, 1, 1], [], []>} : vector<16x128xbf16>, vector<128x128xbf16>, vector<16x128xf32> -> vector<16x128xf32>
    %20 = vector.broadcast %17 : vector<1x128xf32> to vector<16x128xf32>
    %21 = arith.addf %20, %19 : vector<16x128xf32>
    %c0_17 = arith.constant 0 : index
    %c0_18 = arith.constant 0 : index
    %22 = vector.load %arg8[%c0_17, %c0_18] : memref<16x128xf32, #tpu.memory_space<vmem>>, vector<16x128xf32>
    tpu.vector_store %arg8[%c0_17, %c0_18], %21 {strides = array<i32>} : memref<16x128xf32, #tpu.memory_space<vmem>>, vector<16x128xf32>,
    return
  }
  func.func @transform_0(%arg0: i32) -> (i32, i32) {
    %c0_i32 = arith.constant 0 : i32
    %c0_i32_0 = arith.constant 0 : i32
    return %arg0, %c0_i32 : i32, i32
  }
  func.func @transform_1(%arg0: i32) -> (i32, i32) {
    %c0_i32 = arith.constant 0 : i32
    %c0_i32_0 = arith.constant 0 : i32
    %c0_i32_1 = arith.constant 0 : i32
    return %c0_i32, %c0_i32_0 : i32, i32
  }
  func.func @transform_2(%arg0: i32) -> (i32, i32) {
    %c0_i32 = arith.constant 0 : i32
    %c0_i32_0 = arith.constant 0 : i32
    %c0_i32_1 = arith.constant 0 : i32
    return %c0_i32, %c0_i32_0 : i32, i32
  }
  func.func @transform_3(%arg0: i32) -> (i32, i32) {
    %c0_i32 = arith.constant 0 : i32
    %c0_i32_0 = arith.constant 0 : i32
    %c0_i32_1 = arith.constant 0 : i32
    return %c0_i32, %c0_i32_0 : i32, i32
  }
  func.func @transform_4(%arg0: i32) -> (i32, i32) {
    %c0_i32 = arith.constant 0 : i32
    %c0_i32_0 = arith.constant 0 : i32
    %c0_i32_1 = arith.constant 0 : i32
    return %c0_i32, %c0_i32_0 : i32, i32
  }
  func.func @transform_5(%arg0: i32) -> (i32, i32) {
    %c0_i32 = arith.constant 0 : i32
    %c0_i32_0 = arith.constant 0 : i32
    %c0_i32_1 = arith.constant 0 : i32
    return %c0_i32, %c0_i32_0 : i32, i32
  }
  func.func @transform_6(%arg0: i32) -> (i32, i32) {
    %c0_i32 = arith.constant 0 : i32
    %c0_i32_0 = arith.constant 0 : i32
    %c0_i32_1 = arith.constant 0 : i32
    return %c0_i32, %c0_i32_0 : i32, i32
  }
  func.func @transform_7(%arg0: i32) -> (i32, i32) {
    %c0_i32 = arith.constant 0 : i32
    %c0_i32_0 = arith.constant 0 : i32
    return %arg0, %c0_i32 : i32, i32
  }
}

</mosaic_0001>

<bundles_post_ra>
// kernel: mlp_forward_fused.1
= control target key start
LH: loop header
LB: loop body
LE: loop exit
PB: predicated region body
PF: predicated region fallthrough
CT: control target
= control target key end

     0   :  { %12 = vsyncpa [#allocation3], 0  ;;  %s796_s0 = inlined_call_operand.vmem [shape: bf16[16,128], index: 0, kind: input, shape index: {}]   ;;  %s797_s1 = inlined_call_operand.hbm [shape: bf16[128,128], index: 1, kind: input, shape index: {}]   ;;  %s798_s2 = inlined_call_operand.vmem [shape: f32[1,128], index: 2, kind: input, shape index: {}]   ;;  %s799_s3 = inlined_call_operand.hbm [shape: bf16[128,128], index: 3, kind: input, shape index: {}]   ;;  %s800_s4 = inlined_call_operand.vmem [shape: f32[1,128], index: 4, kind: input, shape index: {}]   ;;  %s801_s5 = inlined_call_operand.hbm [shape: bf16[128,128], index: 5, kind: input, shape index: {}]   ;;  %s802_s6 = inlined_call_operand.vmem [shape: f32[1,128], index: 6, kind: input, shape index: {}]   ;;  %s803_s7 = inlined_call_operand.vmem [shape: f32[16,128], index: 7, kind: output, shape index: {}]  }
   0x1   :  { %13 = vsyncpa [#allocation5], 0  ;;  %s649_s24 = smov [#allocation4]   ;;  %s650_s26 = smov [#allocation2]  }
   0x2   :  { %s35_s25 = sshll.u32 %s649_s24, 4  ;;  %s21_s27 = sshll.u32 %s650_s26, 4  ;;  %s36_s25 = int_to_ptr.vmem [resolvable:$true] %s35_s25  ;;  %s696_s27 = int_to_ptr.vmem [resolvable:$true] %s21_s27 }
   0x3   :  { %s579_s30 = scalar_lea.hbm %s799_s3, 1024 }
   0x4   :  { %p580_p0 = scmp.ne.s32.totalorder %s799_s3, %s579_s30  ;;  %p583_p1 = scmp.lt.u32.totalorder %s579_s30, %s799_s3 }
   0x6   :  { %p585_p2 = pnand %p583_p1, %p580_p0 }
   0x8   :  { %588 = shalt.err (!%p585_p2)
}
   0x9   :  { %s589_s12 = scalar_lea.vmem %s36_s25, 1024  ;;  %p594_p4 = scmp.lt.s32.totalorder %s36_s25, %s36_s25 }
   0xa   :  { %p590_p3 = scmp.ne.s32.totalorder %s36_s25, %s589_s12  ;;  %p595_p5 = scmp.lt.s32.totalorder %s589_s12, %s589_s12 }
   0xc   :  { %p596_p6 = por %p595_p5, %p594_p4 }
   0xe   :  { %p597_p7 = pnand %p596_p6, %p590_p3 }
  0x10   :  { %600 = shalt.err (!%p597_p7)
}
  0x11   :  { %s651_s13 = smov 64   ;;  %s652_s14 = smov 4  }
  0x12   :  { %41 = dma.hbm_to_vmem [thread:$0]  %s799_s3, 1024, %s36_s25, [#allocation5], %s651_s13, %s651_s13, %s652_s14  }
  0x13   :  { %s601_s19 = scalar_lea.hbm %s797_s1, 1024 }
  0x14   :  { %p602_p8 = scmp.ne.s32.totalorder %s797_s1, %s601_s19  ;;  %p605_p9 = scmp.lt.u32.totalorder %s601_s19, %s797_s1 }
  0x16   :  { %p607_p10 = pnand %p605_p9, %p602_p8 }
  0x18   :  { %610 = shalt.err (!%p607_p10)
}
  0x19   :  { %s611_s24 = scalar_lea.vmem %s696_s27, 1024  ;;  %p616_p12 = scmp.lt.s32.totalorder %s696_s27, %s696_s27 }
  0x1a   :  { %p612_p11 = scmp.ne.s32.totalorder %s696_s27, %s611_s24  ;;  %p617_p13 = scmp.lt.s32.totalorder %s611_s24, %s611_s24 }
  0x1c   :  { %p618_p0 = por %p617_p13, %p616_p12 }
  0x1e   :  { %p619_p1 = pnand %p618_p0, %p612_p11 }
  0x20   :  { %622 = shalt.err (!%p619_p1)
}
  0x21   :  { %27 = dma.hbm_to_vmem [thread:$0]  %s797_s1, 1024, %s696_s27, [#allocation3], %s651_s13, %s651_s13, %s652_s14  }
  0x22   :  { %s653_s26 = smov [#allocation6]   ;;  %s623_s8 = scalar_lea.hbm %s801_s5, 1024 }
  0x23   :  { %s49_s28 = sshll.u32 %s653_s26, 4  ;;  %p624_p2 = scmp.ne.s32.totalorder %s801_s5, %s623_s8  ;;  %s50_s28 = int_to_ptr.vmem [resolvable:$true] %s49_s28 }
  0x24   :  { %p627_p3 = scmp.lt.u32.totalorder %s623_s8, %s801_s5 }
  0x26   :  { %p629_p4 = pnand %p627_p3, %p624_p2 }
  0x28   :  { %632 = shalt.err (!%p629_p4)
}
  0x29   :  { %s633_s15 = scalar_lea.vmem %s50_s28, 1024  ;;  %p638_p6 = scmp.lt.s32.totalorder %s50_s28, %s50_s28 }
  0x2a   :  { %p634_p5 = scmp.ne.s32.totalorder %s50_s28, %s633_s15  ;;  %p639_p7 = scmp.lt.s32.totalorder %s633_s15, %s633_s15 }
  0x2c   :  { %p640_p8 = por %p639_p7, %p638_p6 }
  0x2e   :  { %p641_p9 = pnand %p640_p8, %p634_p5 }
  0x30   :  { %644 = shalt.err (!%p641_p9)
}
  0x31   :  { %55 = dma.hbm_to_vmem [thread:$0]  %s801_s5, 1024, %s50_s28, [#allocation5], %s651_s13, %s651_s13, %s652_s14  }
  0x32   :  { %645 = dma.done.wait [#allocation3], 1024  }
  0x33   :  { %646 = vsyncadd [#allocation3], 4294966272 }
  0x34   :  { %647 = dma.done.wait [#allocation5], 2048  }
  0x35   :  { %648 = vsyncadd [#allocation5], 4294965248  ;;  %v654_v0 = vmov 0.0   ;;  %vm655_vm0 = vmmov 0   ;;  %v554_v1 = vld [vmem:[#allocation2] sm:$0xff]   ;;  %v555_v2 = vld [vmem:[#allocation2 + $0x8] sm:$0xff]  }
  0x36   :  { %487 = vmatprep.subr.bf16.mxu0 %v654_v0  ;;  %503 = vmatprep.mubr.msk.bf16.mxu0 %vm655_vm0, %v654_v0  ;;  %v556_v3 = vld [vmem:[#allocation2 + $0x10] sm:$0xff]   ;;  %v563_v4 = vld [vmem:[#allocation4] sm:$0xff]   ;;  %v557_v5 = vld [vmem:[#allocation2 + $0x18] sm:$0xff]  }
  0x37   :  { %507 = vmatprep.subr.bf16.mxu1 %v654_v0  ;;  %523 = vmatprep.mubr.msk.bf16.mxu1 %vm655_vm0, %v654_v0  ;;  %v564_v6 = vld [vmem:[#allocation4 + $0x8] sm:$0xff]   ;;  %v558_v7 = vld [vmem:[#allocation2 + $0x20] sm:$0xff]   ;;  %v565_v8 = vld [vmem:[#allocation4 + $0x10] sm:$0xff]  }
  0x38   :  { %488 = vmatpush3.bf16.msra.mxu0 %v554_v1  ;;  %508 = vmatpush3.bf16.msra.mxu1 %v563_v4  ;;  %v559_v9 = vld [vmem:[#allocation2 + $0x28] sm:$0xff]   ;;  %v566_v10 = vld [vmem:[#allocation4 + $0x18] sm:$0xff]   ;;  %v560_v11 = vld [vmem:[#allocation2 + $0x30] sm:$0xff]  }
  0x39   :  { %489 = vmatprep.subr.bf16.mxu0 %v654_v0  ;;  %509 = vmatprep.subr.bf16.mxu1 %v654_v0  ;;  %v567_v12 = vld [vmem:[#allocation4 + $0x20] sm:$0xff]   ;;  %v561_v13 = vld [vmem:[#allocation2 + $0x38] sm:$0xff]   ;;  %v568_v14 = vld [vmem:[#allocation4 + $0x28] sm:$0xff]  }
  0x3a   :  { %v562_v15 = vld [vmem:[%s796_s0] sm:$0xff]   ;;  %v569_v16 = vld [vmem:[#allocation4 + $0x30] sm:$0xff]   ;;  %v570_v17 = vld [vmem:[#allocation4 + $0x38] sm:$0xff]  }
  0x3b   :  { %v571_v18 = vld [vmem:[#allocation6] sm:$0xff]   ;;  %v572_v19 = vld [vmem:[#allocation6 + $0x8] sm:$0xff]   ;;  %v573_v20 = vld [vmem:[#allocation6 + $0x10] sm:$0xff]  }
  0x3c   :  { %490 = vmatpush3.bf16.msra.mxu0 %v555_v2  ;;  %510 = vmatpush3.bf16.msra.mxu1 %v564_v6  ;;  %v574_v21 = vld [vmem:[#allocation6 + $0x18] sm:$0xff]   ;;  %v575_v22 = vld [vmem:[#allocation6 + $0x20] sm:$0xff]   ;;  %v576_v23 = vld [vmem:[#allocation6 + $0x28] sm:$0xff]  }
  0x3d   :  { %491 = vmatprep.subr.bf16.mxu0 %v654_v0  ;;  %511 = vmatprep.subr.bf16.mxu1 %v654_v0  ;;  %v441_v24 = vld [vmem:[%s798_s2] ss:$0 sm:$0xff]  ;;  %v577_v34 = vld [vmem:[#allocation6 + $0x30] sm:$0xff]   ;;  %v578_v35 = vld [vmem:[#allocation6 + $0x38] sm:$0xff]  }
  0x3e   :  { %v450_v36 = vld [vmem:[%s800_s4] ss:$0 sm:$0xff] }
  0x3f   :  { %v459_v46 = vld [vmem:[%s802_s6] ss:$0 sm:$0xff] }
  0x40   :  { %492 = vmatpush3.bf16.msra.mxu0 %v556_v3  ;;  %512 = vmatpush3.bf16.msra.mxu1 %v565_v8 }
  0x41   :  { %493 = vmatprep.subr.bf16.mxu0 %v654_v0  ;;  %513 = vmatprep.subr.bf16.mxu1 %v654_v0 }
  0x44   :  { %494 = vmatpush3.bf16.msra.mxu0 %v557_v5  ;;  %514 = vmatpush3.bf16.msra.mxu1 %v566_v10 }
  0x45   :  { %495 = vmatprep.subr.bf16.mxu0 %v654_v0  ;;  %515 = vmatprep.subr.bf16.mxu1 %v654_v0 }
  0x48   :  { %496 = vmatpush3.bf16.msra.mxu0 %v558_v7  ;;  %516 = vmatpush3.bf16.msra.mxu1 %v567_v12 }
  0x49   :  { %497 = vmatprep.subr.bf16.mxu0 %v654_v0  ;;  %517 = vmatprep.subr.bf16.mxu1 %v654_v0 }
  0x4c   :  { %498 = vmatpush3.bf16.msra.mxu0 %v559_v9  ;;  %518 = vmatpush3.bf16.msra.mxu1 %v568_v14 }
  0x4d   :  { %499 = vmatprep.subr.bf16.mxu0 %v654_v0  ;;  %519 = vmatprep.subr.bf16.mxu1 %v654_v0 }
  0x50   :  { %500 = vmatpush3.bf16.msra.mxu0 %v560_v11  ;;  %520 = vmatpush3.bf16.msra.mxu1 %v569_v16 }
  0x51   :  { %501 = vmatprep.subr.bf16.mxu0 %v654_v0  ;;  %521 = vmatprep.subr.bf16.mxu1 %v654_v0 }
  0x54   :  { %502 = vmatpush3.bf16.msra.mxu0 %v561_v13  ;;  %522 = vmatpush3.bf16.msra.mxu1 %v570_v17 }
  0x55   :  { %527 = vmatprep.subr.bf16.mxu0 %v654_v0 }
  0x57   :  { %504 = vmatmul.mubr.bf16.vlgmr.msra.gmra.mrb[0].mxu0 %v562_v15 }
  0x58   :  { %543 = vmatprep.mubr.msk.bf16.mxu0 %vm655_vm0, %v654_v0  ;;  %528 = vmatpush3.bf16.msra.mxu0 %v571_v18 }
  0x59   :  { %529 = vmatprep.subr.bf16.mxu0 %v654_v0 }
  0x5c   :  { %530 = vmatpush3.bf16.msra.mxu0 %v572_v19 }
  0x5d   :  { %531 = vmatprep.subr.bf16.mxu0 %v654_v0 }
  0x60   :  { %532 = vmatpush3.bf16.msra.mxu0 %v573_v20 }
  0x61   :  { %533 = vmatprep.subr.bf16.mxu0 %v654_v0 }
  0x64   :  { %534 = vmatpush3.bf16.msra.mxu0 %v574_v21 }
  0x65   :  { %535 = vmatprep.subr.bf16.mxu0 %v654_v0 }
  0x68   :  { %536 = vmatpush3.bf16.msra.mxu0 %v575_v22 }
  0x69   :  { %537 = vmatprep.subr.bf16.mxu0 %v654_v0 }
  0x6c   :  { %538 = vmatpush3.bf16.msra.mxu0 %v576_v23 }
  0x6d   :  { %539 = vmatprep.subr.bf16.mxu0 %v654_v0 }
  0x70   :  { %540 = vmatpush3.bf16.msra.mxu0 %v577_v34 }
  0x71   :  { %541 = vmatprep.subr.bf16.mxu0 %v654_v0 }
  0x74   :  { %542 = vmatpush3.bf16.msra.mxu0 %v578_v35 }
 0x12a   :  { %v175_v25 = vpop.f32.mrb[0].mxu0 }
 0x12b   :  { %v188_v26 = vadd.f32 %v441_v24, %v175_v25  ;;  %v505_v27 = vpop.f32.mrb[1].mxu0 }
 0x12c   :  { %v178_v28 = vpop.f32.mrb[2].mxu0 }
 0x12d   :  { %v189_v29 = vadd.f32 %v441_v24, %v178_v28  ;;  %v506_v30 = vpop.f32.mrb[3].mxu0  ;;  %v190_v31 = vmax.f32 %v188_v26, 0.0 }
 0x12f   :  { %v191_v32 = vmax.f32 %v189_v29, 0.0 }
 0x131   :  { %v192_v33 = vpack.c.bf16 %v191_v32, %v190_v31 }
 0x133   :  { %524 = vmatmul.mubr.bf16.vlgmr.msra.gmra.mrb[0].mxu1 %v192_v33 }
 0x206   :  { %v292_v37 = vpop.f32.mrb[0].mxu1 }
 0x207   :  { %v305_v38 = vadd.f32 %v450_v36, %v292_v37  ;;  %v525_v39 = vpop.f32.mrb[1].mxu1 }
 0x208   :  { %v295_v40 = vpop.f32.mrb[2].mxu1 }
 0x209   :  { %v306_v41 = vadd.f32 %v450_v36, %v295_v40  ;;  %v526_v42 = vpop.f32.mrb[3].mxu1  ;;  %v307_v43 = vmax.f32 %v305_v38, 0.0 }
 0x20b   :  { %v308_v44 = vmax.f32 %v306_v41, 0.0 }
 0x20d   :  { %v309_v45 = vpack.c.bf16 %v308_v44, %v307_v43 }
 0x20f   :  { %544 = vmatmul.mubr.bf16.vlgmr.msra.gmra.mrb[4].mxu0 %v309_v45 }
 0x2e2   :  { %v409_v47 = vpop.f32.mrb[4].mxu0 }
 0x2e3   :  { %v422_v48 = vadd.f32 %v459_v46, %v409_v47  ;;  %v545_v49 = vpop.f32.mrb[5].mxu0 }
 0x2e4   :  { %v412_v50 = vpop.f32.mrb[6].mxu0 }
 0x2e5   :  { %424 = vst [vmem:[%s803_s7] sm:$0xff] %v422_v48  ;;  %v423_v51 = vadd.f32 %v459_v46, %v412_v50  ;;  %v546_v52 = vpop.f32.mrb[7].mxu0 }
 0x2e7   :  { %425 = vst [vmem:[%s803_s7 + $0x8] sm:$0xff] %v423_v51 }
 0x2e8   :  { %430 = vsyncpa [#allocation3], 1 }
 0x2e9   :  { %431 = vsyncpa [#allocation5], 1 }

</bundles_post_ra>
